<compile_context>
chip_gen: v7x
topology: tpu7x:2x2x1
jax: 0.10.0
libtpu: 0.0.40
codegen_flags: <defaults>
</compile_context>

<pallas_src>
import functools
import math

import jax
import jax.numpy as jnp
from jax.experimental import pallas as pl
from jax.experimental.pallas import tpu as pltpu

_LANE = 128
_BLOCK_BYTES_SUM = 8 << 20     # target per-input block bytes, sum/mean path
_BLOCK_BYTES_NONE = 4 << 20    # target per-array block bytes, 'none' path
_SMALL_BYTES = 2 << 20         # total bytes below which we use one full-array block
_RAGGED_MAX_ELEMS = 1 << 16    # (1, n) single-block path cap when n % 128 != 0
_VMEM_HEADROOM = 8 << 20
_VMEM_FLOOR = 32 << 20


def _itemsize(dt):
    return jnp.dtype(dt).itemsize


def _sublane_align(dt):
    # packed sublane tile: (8,128) f32, (16,128) bf16, (32,128) int8/fp8
    return max(8, 32 // _itemsize(dt))


def _largest_divisor(rows, limit, align):
    """Largest d with d | rows, d <= limit, d % align == 0 (rows % align == 0)."""
    limit = min(limit, rows)
    limit -= limit % align
    d = limit
    while d >= align:
        if rows % d == 0:
            return d
        d -= align
    return align


def _plan(n, dtypes, block_bytes):
    """Pick a lane-dense (rows, W) view and block rows TM for n elements."""
    esz = [_itemsize(d) for d in dtypes]
    esz_max, esz_sum = max(esz), sum(esz)
    align = max(_sublane_align(d) for d in dtypes)

    W = None
    for cand in (1024, 512, 256, 128):
        if n % cand == 0:
            W = cand
            break

    if W is None:                                   # n not a multiple of 128
        if n <= _RAGGED_MAX_ELEMS:
            return {"mode": "full", "view": (1, n), "pad": 0}
        # TODO(synk): mask the ragged tail in-kernel instead of padding (rare path).
        W = _LANE

    rows = -(-n // W)
    if rows * W == n and rows * W * esz_sum <= _SMALL_BYTES:
        return {"mode": "full", "view": (rows, W), "pad": 0}

    target = max(align, (block_bytes // (W * esz_max)) // align * align)

    if rows * W == n and rows % align == 0:
        # Prefer >=2 blocks so the 'parallel' grid axis can shard rows across
        # TensorCores (v7x has 2 TCs per chip).
        tm = _largest_divisor(rows, min(target, max(align, rows // 2)), align)
        return {"mode": "tiled", "view": (rows, W), "tm": tm, "pad": 0}

    # Awkward size: zero-pad rows (|0-0| = 0 is harmless; 'mean' divides by true n).
    # TODO(synk): replace with in-kernel tail masking to avoid the extra HBM pass.
    tm = target
    rows_p = -(-rows // tm) * tm
    return {"mode": "tiled", "view": (rows_p, W), "tm": tm, "pad": rows_p * W - n}


def _as_view(x, view, pad):
    flat = x.reshape(-1)
    if pad:
        flat = jnp.pad(flat, (0, pad))
    return flat.reshape(view)


# ----------------------------- kernels ------------------------------------ #

def _mae_sum_full_kernel(p_ref, t_ref, o_ref):
    """Whole (small) array in one block: full reduction to a (1,1) scalar."""
    diff = jnp.abs(p_ref[...].astype(jnp.float32) - t_ref[...].astype(jnp.float32))
    o_ref[...] = jnp.sum(diff, keepdims=True)


def _mae_sum_partial_kernel(p_ref, t_ref, o_ref):
    """Fold one (TM, W) block of |p - t| into an (8, W) partial (VPU adds only)."""
    diff = jnp.abs(p_ref[...].astype(jnp.float32) - t_ref[...].astype(jnp.float32))
    tm, w = diff.shape                              # tm is a multiple of 8 by planning
    o_ref[...] = diff.reshape(tm // 8, 8, w).sum(axis=0)


def _mae_abs_kernel(p_ref, t_ref, o_ref):
    """Elementwise |p - t| for reduction='none' (lane-dense output blocks)."""
    dt = o_ref.dtype
    o_ref[...] = jnp.abs(p_ref[...].astype(dt) - t_ref[...].astype(dt))


# ----------------------------- wrappers ------------------------------------ #

def _mae_sum(pred, trg):
    """sum(|pred - trg|) as float32, computed blockwise in a Pallas kernel."""
    n = math.prod(pred.shape)
    esz_in = _itemsize(pred.dtype) + _itemsize(trg.dtype)
    plan = _plan(n, (pred.dtype, trg.dtype), _BLOCK_BYTES_SUM)
    view, pad = plan["view"], plan["pad"]
    p2 = _as_view(pred, view, pad)
    t2 = _as_view(trg, view, pad)

    if plan["mode"] == "full":
        out = pl.pallas_call(
            _mae_sum_full_kernel,
            out_shape=jax.ShapeDtypeStruct((1, 1), jnp.float32),
            grid_spec=pltpu.PrefetchScalarGridSpec(
                num_scalar_prefetch=0,
                grid=(1,),
                in_specs=[pl.BlockSpec(view, lambda i: (0, 0)),
                          pl.BlockSpec(view, lambda i: (0, 0))],
                out_specs=pl.BlockSpec((1, 1), lambda i: (0, 0)),
            ),
            cost_estimate=pl.CostEstimate(
                flops=3 * n, transcendentals=0, bytes_accessed=n * esz_in + 4),
        )(p2, t2)
        return out[0, 0]

    rows, W = view
    TM = plan["tm"]
    nb = rows // TM
    in_block_bytes = TM * W * esz_in
    out_bytes = nb * 8 * W * 4
    vmem_limit = min(max(_VMEM_FLOOR,
                         2 * in_block_bytes + 2 * 8 * W * 4 + _VMEM_HEADROOM),
                     100 << 20)

    partials = pl.pallas_call(
        _mae_sum_partial_kernel,
        out_shape=jax.ShapeDtypeStruct((nb * 8, W), jnp.float32),
        grid_spec=pltpu.PrefetchScalarGridSpec(
            num_scalar_prefetch=0,
            grid=(nb,),
            in_specs=[pl.BlockSpec((TM, W), lambda i: (i, 0)),
                      pl.BlockSpec((TM, W), lambda i: (i, 0))],
            out_specs=pl.BlockSpec((8, W), lambda i: (i, 0)),
        ),
        compiler_params=pltpu.CompilerParams(
            dimension_semantics=("parallel",),
            vmem_limit_bytes=vmem_limit,
        ),
        cost_estimate=pl.CostEstimate(
            flops=3 * n, transcendentals=0,
            bytes_accessed=n * esz_in + out_bytes),
    )(p2, t2)
    # Tiny epilogue: cross-lane/sublane reduce of the per-block partials.
    return jnp.sum(partials, dtype=jnp.float32)


def _mae_none(pred, trg):
    out_dtype = jnp.promote_types(pred.dtype, trg.dtype)
    shape = pred.shape
    n = math.prod(shape)
    esz_all = _itemsize(pred.dtype) + _itemsize(trg.dtype) + _itemsize(out_dtype)
    plan = _plan(n, (pred.dtype, trg.dtype, out_dtype), _BLOCK_BYTES_NONE)
    view, pad = plan["view"], plan["pad"]
    p2 = _as_view(pred, view, pad)
    t2 = _as_view(trg, view, pad)

    cost = pl.CostEstimate(flops=2 * n, transcendentals=0,
                           bytes_accessed=n * esz_all)

    if plan["mode"] == "full":
        out2d = pl.pallas_call(
            _mae_abs_kernel,
            out_shape=jax.ShapeDtypeStruct(view, out_dtype),
            grid_spec=pltpu.PrefetchScalarGridSpec(
                num_scalar_prefetch=0,
                grid=(1,),
                in_specs=[pl.BlockSpec(view, lambda i: (0, 0)),
                          pl.BlockSpec(view, lambda i: (0, 0))],
                out_specs=pl.BlockSpec(view, lambda i: (0, 0)),
            ),
            cost_estimate=cost,
        )(p2, t2)
    else:
        rows, W = view
        TM = plan["tm"]
        nb = rows // TM
        vmem_limit = min(max(_VMEM_FLOOR,
                             2 * TM * W * esz_all + _VMEM_HEADROOM),
                         100 << 20)
        out2d = pl.pallas_call(
            _mae_abs_kernel,
            out_shape=jax.ShapeDtypeStruct(view, out_dtype),
            grid_spec=pltpu.PrefetchScalarGridSpec(
                num_scalar_prefetch=0,
                grid=(nb,),
                in_specs=[pl.BlockSpec((TM, W), lambda i: (i, 0)),
                          pl.BlockSpec((TM, W), lambda i: (i, 0))],
                out_specs=pl.BlockSpec((TM, W), lambda i: (i, 0)),
            ),
            compiler_params=pltpu.CompilerParams(
                dimension_semantics=("parallel",),
                vmem_limit_bytes=vmem_limit,
            ),
            cost_estimate=cost,
        )(p2, t2)

    flat = out2d.reshape(-1)
    if flat.shape[0] != n:                          # only when padding was needed
        flat = flat[:n]
    return flat.reshape(shape)


@functools.partial(jax.jit, static_argnames=("reduction",))
def loss4(pred, trg, reduction="mean"):
    """JAX/Pallas equivalent of the PyTorch Loss4 (MAE) forward pass."""
    if reduction == "none":
        return _mae_none(pred, trg)
    res_dtype = jnp.promote_types(pred.dtype, trg.dtype)
    total = _mae_sum(pred, trg)                     # f32 accumulation
    if reduction == "sum":
        return total.astype(res_dtype)
    count = math.prod(pred.shape)                   # divide by the true element count
    return (total / count).astype(res_dtype)


if __name__ == "__main__":
    key = jax.random.PRNGKey(0)
    k1, k2, k3, k4, k5, k6 = jax.random.split(key, 6)

    cases = [
        # small NCHW f32 (single-block path)
        (jax.random.normal(k1, (2, 4, 16, 16), dtype=jnp.float32),
         jax.random.normal(k2, (2, 4, 16, 16), dtype=jnp.float32), 1e-5, 1e-5),
        # medium f32 (tiled path, >=2 blocks)
        (jax.random.normal(k3, (4, 8, 128, 128), dtype=jnp.float32),
         jax.random.normal(k4, (4, 8, 128, 128), dtype=jnp.float32), 1e-4, 1e-4),
        # bf16 (tiled path with 16-row sublane alignment)
        (jax.random.normal(k5, (8, 8, 128, 128), dtype=jnp.bfloat16),
         jax.random.normal(k6, (8, 8, 128, 128), dtype=jnp.bfloat16), 2e-2, 2e-2),
    ]

    for pred, trg, rtol, atol in cases:
        ref = jnp.abs(pred.astype(jnp.float32) - trg.astype(jnp.float32))
        out_none = jax.block_until_ready(loss4(pred, trg, reduction="none"))
        out_sum = jax.block_until_ready(loss4(pred, trg, reduction="sum"))
        out_mean = jax.block_until_ready(loss4(pred, trg, reduction="mean"))

        assert out_none.shape == pred.shape
        assert out_none.dtype == jnp.promote_types(pred.dtype, trg.dtype)
        assert jnp.allclose(out_none.astype(jnp.float32), ref, rtol=rtol, atol=atol)
        assert jnp.allclose(out_mean.astype(jnp.float32), ref.mean(),
                            rtol=rtol, atol=atol)
        assert jnp.allclose(out_sum.astype(jnp.float32), ref.sum(),
                            rtol=rtol, atol=atol * ref.size)

    print("KERNEL_OK")
</pallas_src>

<mosaic_0001>
module attributes {stable_mosaic.version = 11 : i64} {
  func.func @_mae_abs_kernel(%arg0: i32, %arg1: memref<2x1024xf32, #tpu.memory_space<vmem>>, %arg2: memref<2x1024xf32, #tpu.memory_space<vmem>>, %arg3: memref<2x1024xf32, #tpu.memory_space<vmem>>) attributes {dimension_semantics = [#tpu.dimension_semantics<arbitrary>], iteration_bounds = array<i64: 1>, scalar_prefetch = 0 : i64, scratch_operands = 0 : i64, tpu.core_type = #tpu.core_type<tc>, window_params = [{pipeline_mode = #tpu.pipeline_mode<synchronous>, transform_indices = @transform_0, window_bounds = array<i64: 2, 1024>}, {pipeline_mode = #tpu.pipeline_mode<synchronous>, transform_indices = @transform_1, window_bounds = array<i64: 2, 1024>}, {pipeline_mode = #tpu.pipeline_mode<synchronous>, transform_indices = @transform_2, window_bounds = array<i64: 2, 1024>}]} {
    %c0 = arith.constant 0 : index
    %c0_0 = arith.constant 0 : index
    %0 = vector.load %arg1[%c0, %c0_0] : memref<2x1024xf32, #tpu.memory_space<vmem>>, vector<2x1024xf32>
    %c0_1 = arith.constant 0 : index
    %c0_2 = arith.constant 0 : index
    %1 = vector.load %arg2[%c0_1, %c0_2] : memref<2x1024xf32, #tpu.memory_space<vmem>>, vector<2x1024xf32>
    %2 = arith.subf %0, %1 : vector<2x1024xf32>
    %3 = math.absf %2 : vector<2x1024xf32>
    %c0_3 = arith.constant 0 : index
    %c0_4 = arith.constant 0 : index
    %4 = vector.load %arg3[%c0_3, %c0_4] : memref<2x1024xf32, #tpu.memory_space<vmem>>, vector<2x1024xf32>
    tpu.vector_store %arg3[%c0_3, %c0_4], %3 {strides = array<i32>} : memref<2x1024xf32, #tpu.memory_space<vmem>>, vector<2x1024xf32>,
    return
  }
  func.func @transform_0(%arg0: i32) -> (i32, i32) {
    %c0_i32 = arith.constant 0 : i32
    %c0_i32_0 = arith.constant 0 : i32
    %c0_i32_1 = arith.constant 0 : i32
    return %c0_i32, %c0_i32_0 : i32, i32
  }
  func.func @transform_1(%arg0: i32) -> (i32, i32) {
    %c0_i32 = arith.constant 0 : i32
    %c0_i32_0 = arith.constant 0 : i32
    %c0_i32_1 = arith.constant 0 : i32
    return %c0_i32, %c0_i32_0 : i32, i32
  }
  func.func @transform_2(%arg0: i32) -> (i32, i32) {
    %c0_i32 = arith.constant 0 : i32
    %c0_i32_0 = arith.constant 0 : i32
    %c0_i32_1 = arith.constant 0 : i32
    return %c0_i32, %c0_i32_0 : i32, i32
  }
}

</mosaic_0001>

<bundles_post_ra>
// kernel: loss4.1
= control target key start
LH: loop header
LB: loop body
LE: loop exit
PB: predicated region body
PF: predicated region fallthrough
CT: control target
= control target key end

     0   :  { %s58_s0 = inlined_call_operand.vmem [shape: f32[2,1024], index: 0, kind: input, shape index: {}]   ;;  %s59_s1 = inlined_call_operand.vmem [shape: f32[2,1024], index: 1, kind: input, shape index: {}]   ;;  %s60_s2 = inlined_call_operand.vmem [shape: f32[2,1024], index: 2, kind: output, shape index: {}]  }
   0x1   :  { %v11_v0 = vld [vmem:[%s58_s0] sm:$0xff]  ;;  %v12_v2 = vld [vmem:[%s58_s0 + $0x8] sm:$0xff] }
   0x2   :  { %v13_v1 = vld [vmem:[%s59_s1] sm:$0xff]  ;;  %v14_v4 = vld [vmem:[%s59_s1 + $0x8] sm:$0xff] }
   0x3   :  { %v15_v3 = vsub.f32 %v11_v0, %v13_v1  ;;  %v16_v5 = vsub.f32 %v12_v2, %v14_v4 }
   0x5   :  { %v17_v6 = vand.u32 2147483647, %v15_v3  ;;  %v18_v7 = vand.u32 2147483647, %v16_v5 }
   0x7   :  { %19 = vst [vmem:[%s60_s2] sm:$0xff] %v17_v6  ;;  %20 = vst [vmem:[%s60_s2 + $0x8] sm:$0xff] %v18_v7 }

</bundles_post_ra>
